<compile_context>
chip_gen: v7x
topology: tpu7x:2x2x1
jax: 0.10.0
libtpu: 0.0.40
codegen_flags: <defaults>
</compile_context>

<pallas_src>
import functools

import jax
import jax.numpy as jnp
from jax import lax
from jax.experimental import pallas as pl
from jax.experimental.pallas import tpu as pltpu


# --------------------------------------------------------------------------- kernels
def _upsample_conv_kernel(x_ref, e_ref, w_ref, b_ref, o_ref, *, factor):
    """Fused nearest-upsample(factor) + Conv1d(K, pad=(K-1)//2) on one (batch, L-tile).

    x_ref: (1, TL, Cin)          channels-last input tile
    e_ref: (1, 1, 2, Cin)        halo cols [x[:, tile_start-1], x[:, tile_end]] (0 at seq ends)
    w_ref: (K, Cout, Cin)        conv weights, tap-major
    b_ref: (Cout, 1)             bias (f32)
    o_ref: (1, Cout, TL*factor)  NCL output tile (upsampled length on the lane axis)
    """
    x = x_ref[0]                                    # (TL, Cin)
    tl, cin = x.shape
    k_taps = w_ref.shape[0]
    pad = (k_taps - 1) // 2
    cout = o_ref.shape[1]
    tlu = tl * factor

    # Nearest-neighbour upsample as a sublane repeat (lane dim unchanged -> cheap).
    x_up = jnp.broadcast_to(x[:, None, :], (tl, factor, cin)).reshape(tlu, cin)

    # Neighbour-tile edge columns (zeros at the true sequence boundary); used to fix
    # the <= `pad` rows that wrap around after each roll.  Valid because pad <= factor,
    # so all halo rows map to the single adjacent original column.
    edge = e_ref[0, 0]                              # (2, Cin)
    left = edge[0:1, :]                             # == x[:, tile_start - 1]  (or 0)
    right = edge[1:2, :]                            # == x[:, tile_end]        (or 0)
    row = lax.broadcasted_iota(jnp.int32, (tlu, 1), 0)

    # Accumulator initialised with the bias (hoisted broadcast, f32 accumulation).
    acc = jnp.broadcast_to(b_ref[...].astype(jnp.float32), (cout, tlu))

    # Conv1d as K shifted (Cout, Cin) @ (Cin, TL*factor) MXU matmuls; shifts are XLU
    # rolls + masked edge corrections instead of pad/concat/slice VMEM copies.
    for k in range(k_taps):                         # K = 5, static unroll
        s = pad - k                                 # +2, +1, 0, -1, -2
        if s == 0:
            xs = x_up
        elif s > 0:
            xs = pltpu.roll(x_up, s, axis=0)
            xs = jnp.where(row < s, left, xs)               # rows [0, s) <- left halo
        else:
            xs = pltpu.roll(x_up, s % tlu, axis=0)
            xs = jnp.where(row >= tlu + s, right, xs)       # last |s| rows <- right halo
        acc = acc + lax.dot_general(
            w_ref[k], xs,
            dimension_numbers=(((1,), (1,)), ((), ())),     # contract Cin -> (Cout, TL*f)
            preferred_element_type=jnp.float32)

    o_ref[0] = acc.astype(o_ref.dtype)


def _upsample_only_kernel(x_ref, o_ref, *, factor):
    """Pure nearest-neighbour upsample (no MXU, pure data movement).

    x_ref: (1, TL, C)   o_ref: (1, TL*factor, C)   (channels-last)
    """
    x = x_ref[0]                                    # (TL, C)
    tl, c = x.shape
    o_ref[0] = jnp.broadcast_to(
        x[:, None, :], (tl, factor, c)).reshape(tl * factor, c).astype(o_ref.dtype)


# --------------------------------------------------------------------------- wrapper
def _pick_l_tile(L, factor, c_in, c_out, itemsize, *, vmem_budget=8 << 20,
                 lane_target=1024):
    """Largest L tile that divides L, obeys the (8,128) block rules, keeps the
    upsampled lane dim around `lane_target`, and keeps double-buffered in+out
    blocks within a conservative VMEM budget (fits v5e 16MiB / v7x 32MiB scoped)."""
    max_tile = max(8, lane_target // max(factor, 1))

    def ok(t):
        return (L % t == 0 and t % 8 == 0
                and ((t * factor) % 128 == 0 or t == L))

    def footprint(t):                               # 2x for double buffering
        return 2 * itemsize * t * (c_in + factor * c_out)

    cands = [t for t in range(8, min(L, max_tile) + 1, 8) if ok(t)]
    if ok(L) and L <= max_tile and L not in cands:
        cands.append(L)
    fit = [t for t in sorted(cands) if footprint(t) <= vmem_budget]
    if fit:
        return fit[-1]
    return min(cands) if cands else L


def init_upsample_params(key, channels, out_channels, ksize=5):
    """Deterministic Conv1d param init (PyTorch-style uniform bound)."""
    kw, kb = jax.random.split(key)
    bound = 1.0 / jnp.sqrt(channels * ksize)
    w_oik = jax.random.uniform(kw, (out_channels, channels, ksize),
                               jnp.float32, -bound, bound)      # PyTorch (Cout, Cin, K)
    b = jax.random.uniform(kb, (out_channels,), jnp.float32, -bound, bound)
    return w_oik, b


@functools.partial(jax.jit, static_argnames=("use_conv", "factor", "l_tile", "mxu_dtype"))
def upsample_forward(x_ncl, w_oik=None, b=None, *, use_conv=True, factor=4,
                     l_tile=None, mxu_dtype=None):
    """x_ncl: (B, C, L), like the PyTorch module.  Returns (B, C_out, L*factor).

    mxu_dtype: optionally cast MXU operands (e.g. jnp.bfloat16 on v6e/v7x);
               accumulation stays f32.
    """
    B, C, L = x_ncl.shape
    l_up = L * factor
    itemsize = jnp.dtype(x_ncl.dtype).itemsize

    if not use_conv:
        tl = l_tile or _pick_l_tile(L, factor, C, C, itemsize)
        if L % tl != 0:
            tl = L
        nt = L // tl
        # TODO(synk): per perf review this path is pure data movement; in a real model
        # keep channels-last through the surrounding layers (or just jnp.repeat on NCL)
        # and drop both of these transposes entirely.
        x_lc = jnp.transpose(x_ncl, (0, 2, 1))                  # (B, L, C)
        out_lc = pl.pallas_call(
            functools.partial(_upsample_only_kernel, factor=factor),
            out_shape=jax.ShapeDtypeStruct((B, l_up, C), x_ncl.dtype),
            grid=(B, nt),
            in_specs=[pl.BlockSpec((1, tl, C), lambda bi, ti: (bi, ti, 0))],
            out_specs=pl.BlockSpec((1, tl * factor, C), lambda bi, ti: (bi, ti, 0)),
            compiler_params=pltpu.CompilerParams(
                dimension_semantics=("parallel", "parallel")),
        )(x_lc)
        return jnp.transpose(out_lc, (0, 2, 1))

    c_out, c_in, K = w_oik.shape
    assert c_in == C
    pad = (K - 1) // 2

    tl = l_tile or _pick_l_tile(L, factor, C, c_out, itemsize)
    if L % tl != 0 or factor < pad:
        tl = L                                                   # single-tile fallback
    nt = L // tl

    # Channels-last input (the small array); the (factor*Cout/C)x larger output is
    # written NCL directly by the kernel, so no output-side transpose is needed.
    x_lc = jnp.transpose(x_ncl, (0, 2, 1))                       # (B, L, C)

    # Per-tile halo columns: x[:, t*tl - 1] and x[:, (t+1)*tl]  (zeros at sequence ends).
    zero_col = jnp.zeros((B, 1, C), x_ncl.dtype)
    left = jnp.concatenate([zero_col, x_lc[:, tl - 1:L - 1:tl, :]], axis=1)   # (B, nt, C)
    right = jnp.concatenate([x_lc[:, tl::tl, :], zero_col], axis=1)           # (B, nt, C)
    edges = jnp.stack([left, right], axis=2)                                  # (B, nt, 2, C)

    w_koi = jnp.transpose(w_oik, (2, 0, 1))                      # (K, Cout, Cin)
    b2 = b.reshape(c_out, 1).astype(jnp.float32)

    if mxu_dtype is not None:                                    # e.g. bf16 on v6e/v7x
        x_lc = x_lc.astype(mxu_dtype)
        edges = edges.astype(mxu_dtype)
        w_koi = w_koi.astype(mxu_dtype)

    out = pl.pallas_call(
        functools.partial(_upsample_conv_kernel, factor=factor),
        out_shape=jax.ShapeDtypeStruct((B, c_out, l_up), x_ncl.dtype),
        grid=(B, nt),
        in_specs=[
            pl.BlockSpec((1, tl, C), lambda bi, ti: (bi, ti, 0)),
            pl.BlockSpec((1, 1, 2, C), lambda bi, ti: (bi, ti, 0, 0)),
            pl.BlockSpec((K, c_out, C), lambda bi, ti: (0, 0, 0)),   # resident
            pl.BlockSpec((c_out, 1), lambda bi, ti: (0, 0)),         # resident
        ],
        out_specs=pl.BlockSpec((1, c_out, tl * factor), lambda bi, ti: (bi, 0, ti)),
        compiler_params=pltpu.CompilerParams(
            dimension_semantics=("parallel", "parallel")),
    )(x_lc, edges, w_koi, b2)
    return out


# --------------------------------------------------------------------------- reference
def _reference(x_ncl, w_oik, b, use_conv, factor):
    """Plain-JAX reference mirroring F.interpolate(nearest) + Conv1d."""
    x_up = jnp.repeat(x_ncl, factor, axis=2)
    if not use_conv:
        return x_up
    y = lax.conv_general_dilated(
        x_up, w_oik, window_strides=(1,), padding=[(2, 2)],
        dimension_numbers=("NCH", "OIH", "NCH"))
    return y + b[None, :, None]


if __name__ == "__main__":
    key = jax.random.PRNGKey(0)
    k_x1, k_x2, k_p1, k_p2 = jax.random.split(key, 4)
    factor = 4

    # Case 1: small spec-like shape (single L tile), Cout != Cin.
    B, C, L, Cout = 2, 4, 16, 8
    x1 = jax.random.normal(k_x1, (B, C, L), jnp.float32)
    w1, b1 = init_upsample_params(k_p1, C, Cout, ksize=5)
    y1 = jax.block_until_ready(upsample_forward(x1, w1, b1, use_conv=True, factor=factor))
    r1 = _reference(x1, w1, b1, True, factor)
    assert y1.shape == (B, Cout, L * factor)
    assert jnp.allclose(y1, r1, atol=1e-4, rtol=1e-4), float(jnp.max(jnp.abs(y1 - r1)))

    # Case 2: longer sequence, forced multi-tile grid (exercises roll + halo edges).
    B2, C2, L2 = 2, 4, 1024
    x2 = jax.random.normal(k_x2, (B2, C2, L2), jnp.float32)
    w2, b2 = init_upsample_params(k_p2, C2, C2, ksize=5)
    y2 = jax.block_until_ready(
        upsample_forward(x2, w2, b2, use_conv=True, factor=factor, l_tile=128))
    r2 = _reference(x2, w2, b2, True, factor)
    assert y2.shape == (B2, C2, L2 * factor)
    assert jnp.allclose(y2, r2, atol=1e-4, rtol=1e-4), float(jnp.max(jnp.abs(y2 - r2)))

    # Case 3: use_conv=False (pure nearest upsample, no MXU).
    y3 = jax.block_until_ready(upsample_forward(x2, use_conv=False, factor=factor))
    r3 = _reference(x2, None, None, False, factor)
    assert y3.shape == (B2, C2, L2 * factor)
    assert jnp.allclose(y3, r3)

    print("KERNEL_OK")
</pallas_src>

<mosaic_0001>
module attributes {stable_mosaic.version = 11 : i64} {
  func.func @_upsample_conv_kernel(%arg0: i32, %arg1: i32, %arg2: memref<1x16x4xf32, #tpu.memory_space<vmem>>, %arg3: memref<1x1x2x4xf32, #tpu.memory_space<vmem>>, %arg4: memref<5x8x4xf32, #tpu.memory_space<vmem>>, %arg5: memref<8x1xf32, #tpu.memory_space<vmem>>, %arg6: memref<1x8x64xf32, #tpu.memory_space<vmem>>) attributes {dimension_semantics = [#tpu.dimension_semantics<parallel>, #tpu.dimension_semantics<parallel>], iteration_bounds = array<i64: 2, 1>, scalar_prefetch = 0 : i64, scratch_operands = 0 : i64, tpu.core_type = #tpu.core_type<tc>, window_params = [{transform_indices = @transform_0, window_bounds = array<i64: 1, 16, 4>}, {transform_indices = @transform_1, window_bounds = array<i64: 1, 1, 2, 4>}, {pipeline_mode = #tpu.pipeline_mode<synchronous>, transform_indices = @transform_2, window_bounds = array<i64: 5, 8, 4>}, {pipeline_mode = #tpu.pipeline_mode<synchronous>, transform_indices = @transform_3, window_bounds = array<i64: 8, 1>}, {transform_indices = @transform_4, window_bounds = array<i64: 1, 8, 64>}]} {
    %c0 = arith.constant 0 : index
    %c0_0 = arith.constant 0 : index
    %c0_1 = arith.constant 0 : index
    %0 = vector.load %arg2[%c0, %c0_0, %c0_1] : memref<1x16x4xf32, #tpu.memory_space<vmem>>, vector<1x16x4xf32>
    %1 = vector.shape_cast %0 : vector<1x16x4xf32> to vector<16x4xf32>
    %2 = vector.shape_cast %1 : vector<16x4xf32> to vector<16x1x4xf32>
    %3 = vector.shape_cast %2 : vector<16x1x4xf32> to vector<16x1x4xf32>
    %4 = vector.broadcast %3 : vector<16x1x4xf32> to vector<16x4x4xf32>
    %5 = vector.shape_cast %4 : vector<16x4x4xf32> to vector<64x4xf32>
    %c0_2 = arith.constant 0 : index
    %c0_3 = arith.constant 0 : index
    %c0_4 = arith.constant 0 : index
    %c0_5 = arith.constant 0 : index
    %6 = vector.load %arg3[%c0_2, %c0_3, %c0_4, %c0_5] : memref<1x1x2x4xf32, #tpu.memory_space<vmem>>, vector<1x1x2x4xf32>
    %7 = vector.shape_cast %6 : vector<1x1x2x4xf32> to vector<2x4xf32>
    %8 = vector.extract_strided_slice %7 {offsets = [0, 0], sizes = [1, 4], strides = [1, 1]} : vector<2x4xf32> to vector<1x4xf32>
    %9 = vector.extract_strided_slice %7 {offsets = [1, 0], sizes = [1, 4], strides = [1, 1]} : vector<2x4xf32> to vector<1x4xf32>
    %10 = tpu.iota {dimensions = array<i32: 0>} : vector<64x1xi32>
    %c0_6 = arith.constant 0 : index
    %c0_7 = arith.constant 0 : index
    %11 = vector.load %arg5[%c0_6, %c0_7] : memref<8x1xf32, #tpu.memory_space<vmem>>, vector<8x1xf32>
    %12 = vector.shape_cast %11 : vector<8x1xf32> to vector<8x1xf32>
    %13 = vector.broadcast %12 : vector<8x1xf32> to vector<8x64xf32>
    %c2_i32 = arith.constant 2 : i32
    %14 = tpu.dynamic_rotate %5 by %c2_i32 dim 0 : vector<64x4xf32>, i32 -> vector<64x4xf32>
    %c2_i32_8 = arith.constant 2 : i32
    %15 = vector.broadcast %c2_i32_8 : i32 to vector<64x1xi32>
    %16 = arith.cmpi slt, %10, %15 : vector<64x1xi32>
    %17 = vector.shape_cast %16 : vector<64x1xi1> to vector<64x1xi1>
    %18 = vector.broadcast %17 : vector<64x1xi1> to vector<64x4xi1>
    %19 = vector.shape_cast %8 : vector<1x4xf32> to vector<1x4xf32>
    %20 = vector.broadcast %19 : vector<1x4xf32> to vector<64x4xf32>
    %21 = arith.select %18, %20, %14 : vector<64x4xi1>, vector<64x4xf32>
    %c0_9 = arith.constant 0 : index
    %c0_10 = arith.constant 0 : index
    %c0_11 = arith.constant 0 : index
    %22 = vector.load %arg4[%c0_9, %c0_10, %c0_11] : memref<5x8x4xf32, #tpu.memory_space<vmem>>, vector<1x8x4xf32>
    %23 = vector.shape_cast %22 : vector<1x8x4xf32> to vector<8x4xf32>
    %cst = arith.constant dense<0.000000e+00> : vector<8x64xf32>
    %24 = tpu.matmul %23, %21, %cst {dimension_numbers = #tpu.dot_dimension_numbers<[1], [1], [0], [0], [0, 0, 1, 0], [], []>} : vector<8x4xf32>, vector<64x4xf32>, vector<8x64xf32> -> vector<8x64xf32>
    %25 = arith.addf %13, %24 : vector<8x64xf32>
    %c1_i32 = arith.constant 1 : i32
    %26 = tpu.dynamic_rotate %5 by %c1_i32 dim 0 : vector<64x4xf32>, i32 -> vector<64x4xf32>
    %c1_i32_12 = arith.constant 1 : i32
    %27 = vector.broadcast %c1_i32_12 : i32 to vector<64x1xi32>
    %28 = arith.cmpi slt, %10, %27 : vector<64x1xi32>
    %29 = vector.shape_cast %28 : vector<64x1xi1> to vector<64x1xi1>
    %30 = vector.broadcast %29 : vector<64x1xi1> to vector<64x4xi1>
    %31 = vector.shape_cast %8 : vector<1x4xf32> to vector<1x4xf32>
    %32 = vector.broadcast %31 : vector<1x4xf32> to vector<64x4xf32>
    %33 = arith.select %30, %32, %26 : vector<64x4xi1>, vector<64x4xf32>
    %c1 = arith.constant 1 : index
    %c0_13 = arith.constant 0 : index
    %c0_14 = arith.constant 0 : index
    %34 = vector.load %arg4[%c1, %c0_13, %c0_14] : memref<5x8x4xf32, #tpu.memory_space<vmem>>, vector<1x8x4xf32>
    %35 = vector.shape_cast %34 : vector<1x8x4xf32> to vector<8x4xf32>
    %cst_15 = arith.constant dense<0.000000e+00> : vector<8x64xf32>
    %36 = tpu.matmul %35, %33, %cst_15 {dimension_numbers = #tpu.dot_dimension_numbers<[1], [1], [0], [0], [0, 0, 1, 0], [], []>} : vector<8x4xf32>, vector<64x4xf32>, vector<8x64xf32> -> vector<8x64xf32>
    %37 = arith.addf %25, %36 : vector<8x64xf32>
    %c2 = arith.constant 2 : index
    %c0_16 = arith.constant 0 : index
    %c0_17 = arith.constant 0 : index
    %38 = vector.load %arg4[%c2, %c0_16, %c0_17] : memref<5x8x4xf32, #tpu.memory_space<vmem>>, vector<1x8x4xf32>
    %39 = vector.shape_cast %38 : vector<1x8x4xf32> to vector<8x4xf32>
    %cst_18 = arith.constant dense<0.000000e+00> : vector<8x64xf32>
    %40 = tpu.matmul %39, %5, %cst_18 {dimension_numbers = #tpu.dot_dimension_numbers<[1], [1], [0], [0], [0, 0, 1, 0], [], []>} : vector<8x4xf32>, vector<64x4xf32>, vector<8x64xf32> -> vector<8x64xf32>
    %41 = arith.addf %37, %40 : vector<8x64xf32>
    %c63_i32 = arith.constant 63 : i32
    %42 = tpu.dynamic_rotate %5 by %c63_i32 dim 0 : vector<64x4xf32>, i32 -> vector<64x4xf32>
    %c63_i32_19 = arith.constant 63 : i32
    %43 = vector.broadcast %c63_i32_19 : i32 to vector<64x1xi32>
    %44 = arith.cmpi sge, %10, %43 : vector<64x1xi32>
    %45 = vector.shape_cast %44 : vector<64x1xi1> to vector<64x1xi1>
    %46 = vector.broadcast %45 : vector<64x1xi1> to vector<64x4xi1>
    %47 = vector.shape_cast %9 : vector<1x4xf32> to vector<1x4xf32>
    %48 = vector.broadcast %47 : vector<1x4xf32> to vector<64x4xf32>
    %49 = arith.select %46, %48, %42 : vector<64x4xi1>, vector<64x4xf32>
    %c3 = arith.constant 3 : index
    %c0_20 = arith.constant 0 : index
    %c0_21 = arith.constant 0 : index
    %50 = vector.load %arg4[%c3, %c0_20, %c0_21] : memref<5x8x4xf32, #tpu.memory_space<vmem>>, vector<1x8x4xf32>
    %51 = vector.shape_cast %50 : vector<1x8x4xf32> to vector<8x4xf32>
    %cst_22 = arith.constant dense<0.000000e+00> : vector<8x64xf32>
    %52 = tpu.matmul %51, %49, %cst_22 {dimension_numbers = #tpu.dot_dimension_numbers<[1], [1], [0], [0], [0, 0, 1, 0], [], []>} : vector<8x4xf32>, vector<64x4xf32>, vector<8x64xf32> -> vector<8x64xf32>
    %53 = arith.addf %41, %52 : vector<8x64xf32>
    %c62_i32 = arith.constant 62 : i32
    %54 = tpu.dynamic_rotate %5 by %c62_i32 dim 0 : vector<64x4xf32>, i32 -> vector<64x4xf32>
    %c62_i32_23 = arith.constant 62 : i32
    %55 = vector.broadcast %c62_i32_23 : i32 to vector<64x1xi32>
    %56 = arith.cmpi sge, %10, %55 : vector<64x1xi32>
    %57 = vector.shape_cast %56 : vector<64x1xi1> to vector<64x1xi1>
    %58 = vector.broadcast %57 : vector<64x1xi1> to vector<64x4xi1>
    %59 = vector.shape_cast %9 : vector<1x4xf32> to vector<1x4xf32>
    %60 = vector.broadcast %59 : vector<1x4xf32> to vector<64x4xf32>
    %61 = arith.select %58, %60, %54 : vector<64x4xi1>, vector<64x4xf32>
    %c4 = arith.constant 4 : index
    %c0_24 = arith.constant 0 : index
    %c0_25 = arith.constant 0 : index
    %62 = vector.load %arg4[%c4, %c0_24, %c0_25] : memref<5x8x4xf32, #tpu.memory_space<vmem>>, vector<1x8x4xf32>
    %63 = vector.shape_cast %62 : vector<1x8x4xf32> to vector<8x4xf32>
    %cst_26 = arith.constant dense<0.000000e+00> : vector<8x64xf32>
    %64 = tpu.matmul %63, %61, %cst_26 {dimension_numbers = #tpu.dot_dimension_numbers<[1], [1], [0], [0], [0, 0, 1, 0], [], []>} : vector<8x4xf32>, vector<64x4xf32>, vector<8x64xf32> -> vector<8x64xf32>
    %65 = arith.addf %53, %64 : vector<8x64xf32>
    %c0_27 = arith.constant 0 : index
    %c0_28 = arith.constant 0 : index
    %c0_29 = arith.constant 0 : index
    %66 = vector.load %arg6[%c0_27, %c0_28, %c0_29] : memref<1x8x64xf32, #tpu.memory_space<vmem>>, vector<1x8x64xf32>
    %67 = vector.shape_cast %66 : vector<1x8x64xf32> to vector<8x64xf32>
    %68 = vector.shape_cast %65 : vector<8x64xf32> to vector<1x8x64xf32>
    tpu.vector_store %arg6[%c0_27, %c0_28, %c0_29], %68 {strides = array<i32>} : memref<1x8x64xf32, #tpu.memory_space<vmem>>, vector<1x8x64xf32>,
    return
  }
  func.func @transform_0(%arg0: i32, %arg1: i32) -> (i32, i32, i32) {
    %c0_i32 = arith.constant 0 : i32
    %c0_i32_0 = arith.constant 0 : i32
    return %arg0, %arg1, %c0_i32 : i32, i32, i32
  }
  func.func @transform_1(%arg0: i32, %arg1: i32) -> (i32, i32, i32, i32) {
    %c0_i32 = arith.constant 0 : i32
    %c0_i32_0 = arith.constant 0 : i32
    %c0_i32_1 = arith.constant 0 : i32
    return %arg0, %arg1, %c0_i32, %c0_i32_0 : i32, i32, i32, i32
  }
  func.func @transform_2(%arg0: i32, %arg1: i32) -> (i32, i32, i32) {
    %c0_i32 = arith.constant 0 : i32
    %c0_i32_0 = arith.constant 0 : i32
    %c0_i32_1 = arith.constant 0 : i32
    %c0_i32_2 = arith.constant 0 : i32
    return %c0_i32, %c0_i32_0, %c0_i32_1 : i32, i32, i32
  }
  func.func @transform_3(%arg0: i32, %arg1: i32) -> (i32, i32) {
    %c0_i32 = arith.constant 0 : i32
    %c0_i32_0 = arith.constant 0 : i32
    %c0_i32_1 = arith.constant 0 : i32
    return %c0_i32, %c0_i32_0 : i32, i32
  }
  func.func @transform_4(%arg0: i32, %arg1: i32) -> (i32, i32, i32) {
    %c0_i32 = arith.constant 0 : i32
    %c0_i32_0 = arith.constant 0 : i32
    return %arg0, %c0_i32, %arg1 : i32, i32, i32
  }
}

</mosaic_0001>

<bundles_post_ra>
// kernel: upsample_forward.1
= control target key start
LH: loop header
LB: loop body
LE: loop exit
PB: predicated region body
PF: predicated region fallthrough
CT: control target
= control target key end

     0   :  { %9 = vsyncpa [#allocation3], 0  ;;  %s2127_s0 = inlined_call_operand.vmem [shape: f32[2,16,4], index: 0, kind: input, shape index: {}]   ;;  %s2128_s1 = inlined_call_operand.vmem [shape: f32[2,1,2,4], index: 1, kind: input, shape index: {}]   ;;  %s2129_s2 = inlined_call_operand.vmem [shape: f32[5,8,4], index: 2, kind: input, shape index: {}]   ;;  %s2130_s3 = inlined_call_operand.vmem [shape: f32[8,1], index: 3, kind: input, shape index: {}]   ;;  %s2131_s4 = inlined_call_operand.hbm [shape: f32[2,8,64], index: 4, kind: output, shape index: {}]  }
   0x1   :  { %11 = vsyncpa [#allocation3 + $0x1], 0  ;;  %s1717_s15 = smov 0   ;;  %s1719_s16 = smov 0  }
   0x2   :  { %s1721_s17 = smov 0   ;;  %s1723_s18 = smov 0  }
   0x3   :  { %s1725_s19 = smov 0   ;;  %s1727_s20 = smov 0  }
   0x4 LB: > { %s1252_s21 = sadd.s32 4294967295, %s1684_s20   ;;  %s1253_s22 = sadd.s32 4294967294, %s1684_s20   ;;  %s1684_s20 = sphi %s1727_s20, %s17_s20   ;;  %s1680_s19 = sphi %s1725_s19, %s2140_s19   ;;  %s1676_s18 = sphi %s1723_s18, %s2139_s18   ;;  %s1672_s17 = sphi %s1721_s17, %s2138_s17   ;;  %s1668_s16 = sphi %s1719_s16, %s2137_s16   ;;  %s1664_s15 = sphi %s1717_s15, %s2136_s15  }
   0x5   : > { %s29_s23 = sadd.s32 1, %s1680_s19  ;;  %s136_s24 = sadd.s32 1, %s1672_s17 }
   0x6   : > { %p31_p0 = scmp.ge.s32.totalorder %s29_s23, 2  ;;  %p146_p1 = scmp.ne.s32.totalorder %s1672_s17, %s1668_s16 }
   0x7   : > { %p147_p2 = scmp.eq.s32.totalorder %s1252_s21, 1  ;;  %p152_p3 = scmp.ne.s32.totalorder %s1668_s16, %s1664_s15 }
   0x8   : > { %s2142_s23 = smov (%p31_p0, %s29_s23), 0  ;;  %p153_p5 = scmp.eq.s32.totalorder %s1253_s22, 1 }
   0x9   : > { %p1757_p4 = por %p147_p2, %p146_p1  ;;  %s131_s26 = ssub.s32 %s1680_s19, %s2142_s23 }
   0xa   : > { %p1256_p6 = scmp.ge.s32.totalorder %s1684_s20, 1  ;;  %p134_p7 = scmp.eq.s32.totalorder %s131_s26, 0 }
   0xb   : > { %p1764_p8 = por %p153_p5, %p152_p3  ;;  %p200_p9 = scmp.lt.s32.totalorder %s1684_s20, 3 }
   0xc   : > { %s1770_s28 = scalar_select %p134_p7, %s1672_s17, %s136_s24  }
   0xd   : > { %p201_p10 = pnand %p1256_p6, %p200_p9 }
   0xe   : > { %p238_p11 = scmp.lt.s32.totalorder (!%p201_p10), %s1676_s18, 1  ;;  %v262_v0 = vlaneseq (!%p201_p10)  ;;  %v1686_v1 = vmov (!%p201_p10), 0.0|0.0   ;;  %v1687_v2 = vmov (!%p201_p10), 1966171168   ;;  %vm1688_vm0 = vmmov (!%p201_p10), 0   ;;  %v430_v6 = vld [vmem:[%s2130_s3] sm:$0xff] (!%p201_p10) }
   0xf   : > { %204 = sbr.rel (%p201_p10) target bundleno = 364 (0x16c), region = 36  ;;  %1487 = vmatprep.subr.bf16.mxu0 (!%p201_p10), %v1686_v1  ;;  %v260_v3 = vunpack.c.l.s4 (!%p201_p10), %v1687_v2  ;;  %1455 = vmatprep.subr.bf16.mxu1 (!%p201_p10), %v1686_v1  ;;  %v1689_v5 = vmov (!%p201_p10), 0.0   ;;  %v1690_v8 = vmov (!%p201_p10), 0   ;;  %vm505_vm1 = vcmask (!%p201_p10), 31744   ;;  %s234_s8 = sand.u32 (!%p201_p10), 1, %s1668_s16  }
  0x10   : > { %v1778_v4 = vshrl.u32 (!%p201_p10), %v262_v0, 7  ;;  %1414 = vmatprep.mubr.msk.f32.mxu0 (!%p201_p10), %vm1688_vm0, %v1689_v5  ;;  %1376 = vmatprep.mubr.msk.f32.mxu1 (!%p201_p10), %vm1688_vm0, %v1689_v5  ;;  %vm1822_vm2 = vmpackc.low (!%p201_p10), %vm505_vm1, %vm505_vm1  ;;  %vm1146_vm9 = vcmask (!%p201_p10), 523264   ;;  %s1149_s22 = scalar_lea.sflag (!%p201_p10), [#allocation3], %s234_s8  ;;  %s1691_s24 = smov (!%p201_p10), [#allocation2]  }
  0x11   : > { %v261_v7 = vunpack.c.0.s8 (!%p201_p10), %v260_v3  ;;  %1603 = vset.pattern.permute.xlu0 (!%p201_p10), %v1690_v8  ;;  %s1610_s26 = sshll.u32 (!%p201_p10), %s1691_s24, 4  ;;  %s1611_s26 = int_to_ptr.vmem [resolvable:$false] %s1610_s26 }
  0x12   : > { %433 = vperm.xlu0 (!%p201_p10), %1603, %v430_v6   ;;  %v1793_v15 = vsub.s32 (!%p201_p10), 0, %v1778_v4  ;;  %vm460_vm3 = vcmp.lt.s32.totalorder (!%p201_p10), %v1778_v4, 2  ;;  %vm1005_vm5 = vcmp.lt.s32.totalorder (!%p201_p10), %v1778_v4, 6  ;;  %vm852_vm6 = vcmp.lt.s32.totalorder (!%p201_p10), %v1778_v4, 7 }
  0x13   : > { %v264_v9 = vsub.s32 (!%p201_p10), %v261_v7, %v1778_v4  ;;  %vm612_vm7 = vcmp.lt.s32.totalorder (!%p201_p10), %v1778_v4, 1 }
  0x16   : > { %s1776_s29 = scalar_select %p238_p11, %s1676_s18, 1 }
  0x18   : > { %s1314_s6 = sshll.u32 %s1776_s29, 4  ;;  %s1260_s10 = sshll.u32 %s1776_s29, 1 }
  0x19   : > { %s245_s9 = scalar_lea.vmem %s2127_s0, %s1314_s6  ;;  %s253_s13 = scalar_lea.vmem %s2128_s1, %s1260_s10 }
  0x1a   : > { %v254_v10 = vld [vmem:[%s245_s9] sm:$0xff]  ;;  %v255_v11 = vld [vmem:[%s245_s9 + $0x8] sm:$0xff]  ;;  %s1257_s9 = sshll.u32 %s234_s8, 3  ;;  %s1311_s10 = sshll.u32 %s1676_s18, 7 }
  0x1b   : > { %v258_v12 = vcombine.high %v254_v10, %v254_v10  ;;  %v265_v13 = vrot.slane %v254_v10, %v264_v9  ;;  %v307_v14 = vcombine.high %v255_v11, %v255_v11  ;;  %v314_v16 = vrot.slane %v255_v11, %v264_v9  ;;  %v420_v46 = vld [vmem:[%s253_s13] sm:$0x3]  ;;  %s236_s11 = scalar_lea.vmem [#allocation2], %s1257_s9  ;;  %s2080_s21 = scalar_lea.hbm %s2131_s4, %s1311_s10 }
  0x1c   : > { %v1835_v55 = vrot.slane %v420_v46, %v1793_v15  ;;  %s1163_s12 = sshll.u32 %s236_s11, 4  ;;  %s1612_s29 = scalar_lea.vmem %s1611_s26, 256  ;;  %s2082_s12 = int_to_ptr.vmem [resolvable:$true] %s1163_s12 }
  0x1d   : > { %v273_v17 = vcombine.high %v265_v13, %v265_v13  ;;  %v281_v18 = vrot.slane %v265_v13, %v264_v9  ;;  %v321_v19 = vrot.slane %v307_v14, %v264_v9  ;;  %v272_v20 = vrot.slane %v258_v12, %v264_v9  ;;  %s1606_s18 = scalar_lea.vmem %s2082_s12, 128  ;;  %p1613_p1 = scmp.lt.s32.totalorder %s2082_s12, %s1611_s26 }
  0x1e   : > { %v322_v28 = vcombine.high %v314_v16, %v314_v16  ;;  %v330_v39 = vrot.slane %v314_v16, %v264_v9  ;;  %p1607_p12 = scmp.ne.s32.totalorder %s2082_s12, %s1606_s18  ;;  %p1614_p2 = scmp.lt.s32.totalorder %s1612_s29, %s1606_s18 }
  0x1f   : > { %v295_v21 = vrot.slane %v273_v17, %v264_v9  ;;  %v303_v22 = vcombine.high %v281_v18, %v281_v18  ;;  %v323_v23 = vcombine.high %v321_v19, %v321_v19  ;;  %v359_v24 = vrot.slane %v281_v18, %v1793_v15 }
  0x20   : > { %v1797_v25 = vrot.slane %v321_v19, %v264_v9  ;;  %v274_v26 = vcombine.high %v272_v20, %v272_v20  ;;  %v288_v27 = vrot.slane %v272_v20, %v264_v9  ;;  %v344_v43 = vrot.slane %v322_v28, %v264_v9  ;;  %p1608_p13 = pnand %p1607_p12, %p1757_p4  ;;  %p1615_p3 = por %p1614_p2, %p1613_p1 }
  0x21   : > { %v305_v29 = vcombine.high %v295_v21, %v295_v21  ;;  %v363_v30 = vrot.slane %v295_v21, %v1793_v15  ;;  %v367_v31 = vrot.slane %v303_v22, %v1793_v15  ;;  %v1801_v32 = vrot.slane %v323_v23, %v264_v9 }
  0x22   : > { %v353_v33 = vcombine.high %v1797_v25, %v1797_v25  ;;  %v302_v34 = vrot.slane %v274_v26, %v264_v9  ;;  %v304_v35 = vcombine.high %v288_v27, %v288_v27  ;;  %v375_v42 = vrot.slane %v288_v27, %v1793_v15  ;;  %p1609_p0 = pneg %p1608_p13 }
  0x23   : > { %v371_v36 = vrot.slane %v305_v29, %v1793_v15  ;;  %v1809_v37 = vcombine.low %v359_v24, %v363_v30  ;;  %v355_v38 = vcombine.high %v1801_v32, %v1801_v32  ;;  %v352_v56 = vcombine.high %v330_v39, %v330_v39 }
  0x24   : > { %v415_v40 = vrot.slane %v353_v33, %v1793_v15  ;;  %v306_v41 = vcombine.high %v302_v34, %v302_v34  ;;  %v379_v47 = vrot.slane %v302_v34, %v1793_v15  ;;  %v383_v48 = vrot.slane %v304_v35, %v1793_v15  ;;  %p1616_p5 = pnand %p1615_p3, %p1609_p0 }
  0x25   : > { %v1815_v44 = vcombine.low %v367_v31, %v371_v36  ;;  %v419_v45 = vrot.slane %v355_v38, %v1793_v15  ;;  %v452_v50 = vrot.slane %v1809_v37, 6  ;;  %v354_v60 = vcombine.high %v344_v43, %v344_v43 }
  0x26   : > { %v387_v51 = vrot.slane %v306_v41, %v1793_v15  ;;  %v1840_v58 = vcombine.low %v375_v42, %v379_v47  ;;  %v391_v63 = vrot.slane %v330_v39, %v1793_v15  ;;  %v395_v6 = vrot.slane %v344_v43, %v1793_v15 }
  0x27   : > { %v1488_v52 = vpack.c.bf16 %v1815_v44, %v1809_v37  ;;  %v1830_v53 = vcombine.low %v415_v40, %v419_v45  ;;  %v453_v54 = vrot.slane %v1815_v44, 6  ;;  %v399_v9 = vrot.slane %v352_v56, %v1793_v15 }
  0x28   : > { %v1842_v59 = vcombine.low %v383_v48, %v387_v51  ;;  %v454_v2 = vrot.slane %v1840_v58, 6  ;;  %v403_v10 = vrot.slane %v354_v60, %v1793_v15  ;;  %v1869_v13 = vcombine.low %v391_v63, %v395_v6  ;;  %v1280_v51 = vld [vmem:[%s2129_s2 + $0x10] sm:$0xff] }
  0x29   : > { %1490 = vmatpush3.bf16.xpose.msk.msra.mxu0 %vm1822_vm2, %v1488_v52  ;;  %v459_v57 = vrot.slane %v1830_v53, 6  ;;  %v467_v61 = vsel %vm460_vm3, %v452_v50, %v453_v54  ;;  %v407_v20 = vrot.slane %v1797_v25, %v1793_v15  ;;  %v411_v21 = vrot.slane %v1801_v32, %v1793_v15 }
  0x2a   : > { %1491 = vmatprep.subr.bf16.mxu0 %v1686_v1  ;;  %v455_v3 = vrot.slane %v1842_v59, 6  ;;  %v1492_v8 = vpack.c.bf16 %v1842_v59, %v1840_v58  ;;  %v466_v12 = vsel %vm460_vm3, %v453_v54, %v454_v2  ;;  %v1871_v14 = vcombine.low %v399_v9, %v403_v10 }
  0x2b   : > { %v468_v62 = vsel %vm460_vm3, %v459_v57, %v452_v50  ;;  %v456_v17 = vrot.slane %v1869_v13, 6  ;;  %v887_v24 = vsub.s32 1, %v1778_v4  ;;  %v1892_v25 = vcombine.low %v407_v20, %v411_v21 }
  0x2c   : > { %v496_v0 = vsel %vm460_vm3, %v1835_v55, %v468_v62  ;;  %v465_v11 = vsel %vm460_vm3, %v454_v2, %v455_v3  ;;  %v457_v18 = vrot.slane %v1871_v14, 6  ;;  %v1496_v19 = vpack.c.bf16 %v1871_v14, %v1869_v13 }
  0x2d   : > { %v1456_v7 = vpack.c.bf16 %v467_v61, %v496_v0  ;;  %v1460_v16 = vpack.c.bf16 %v465_v11, %v466_v12  ;;  %v464_v23 = vsel %vm460_vm3, %v455_v3, %v456_v17  ;;  %v1895_v15 = vadd.s32 56, %v1778_v4  ;;  %v504_v0 = vld [vmem:[%s2129_s2] sm:$0xff] }
  0x2e   : > { %v463_v22 = vsel %vm460_vm3, %v456_v17, %v457_v18  ;;  %v458_v27 = vrot.slane %v1892_v25, 6  ;;  %v997_v28 = vrot.slane %v1809_v37, 2  ;;  %v1003_v29 = vrot.slane %v1892_v25, 2 }
  0x2f   : > { %1458 = vmatpush3.bf16.xpose.msk.msra.mxu1 %vm1822_vm2, %v1456_v7  ;;  %v1464_v26 = vpack.c.bf16 %v463_v22, %v464_v23  ;;  %vm1021_vm4 = vcmp.ge.s32.totalorder %v1895_v15, 62  ;;  %v1004_v30 = vrot.slane %v1830_v53, 2  ;;  %v1903_v31 = vrot.slane %v420_v46, %v887_v24 }
  0x30   : > { %1459 = vmatprep.subr.bf16.mxu1 %v1686_v1  ;;  %v1500_v32 = vpack.c.bf16 %v1830_v53, %v1892_v25  ;;  %v844_v33 = vrot.slane %v1809_v37, 1  ;;  %v845_v34 = vrot.slane %v1815_v44, 1  ;;  %v846_v35 = vrot.slane %v1840_v58, 1 }
  0x31   : > { %1494 = vmatpush3.bf16.xpose.msk.msra.mxu0 %vm1822_vm2, %v1492_v8  ;;  %v1915_v36 = vsel %vm1005_vm5, %v1003_v29, %v1004_v30  ;;  %v1013_v38 = vsel %vm1005_vm5, %v1004_v30, %v997_v28  ;;  %v461_v40 = vsel %vm460_vm3, %v458_v27, %v459_v57  ;;  %v462_v41 = vsel %vm460_vm3, %v457_v18, %v458_v27 }
  0x32   : > { %1495 = vmatprep.subr.bf16.mxu0 %v1686_v1  ;;  %v1925_v39 = vsel %vm1021_vm4, %v1903_v31, %v1013_v38  ;;  %v604_v43 = vrot.slane %v1809_v37, 7  ;;  %v611_v45 = vrot.slane %v1830_v53, 7  ;;  %v858_v46 = vsel %vm852_vm6, %v845_v34, %v846_v35 }
  0x33   : > { %v1532_v42 = vpack.c.bf16 %v1925_v39, %v1915_v36  ;;  %v859_v47 = vsel %vm852_vm6, %v844_v33, %v845_v34  ;;  %v1468_v48 = vpack.c.bf16 %v461_v40, %v462_v41  ;;  %v605_v50 = vrot.slane %v1815_v44, 7 }
  0x34   : > { %v1504_v52 = vpack.c.bf16 %v858_v46, %v859_v47  ;;  %v620_v54 = vsel %vm612_vm7, %v611_v45, %v604_v43  ;;  %v847_v56 = vrot.slane %v1842_v59, 1  ;;  %v848_v57 = vrot.slane %v1869_v13, 1 }
  0x35   : > { %v619_v60 = vsel %vm612_vm7, %v604_v43, %v605_v50  ;;  %v644_v61 = vsel %vm612_vm7, %v1835_v55, %v620_v54  ;;  %v606_v55 = vrot.slane %v1840_v58, 7  ;;  %v607_v3 = vrot.slane %v1842_v59, 7 }
  0x36   : > { %v856_v62 = vsel %vm852_vm6, %v847_v56, %v848_v57  ;;  %v857_v63 = vsel %vm852_vm6, %v846_v35, %v847_v56  ;;  %v1472_v2 = vpack.c.bf16 %v619_v60, %v644_v61  ;;  %v849_v7 = vrot.slane %v1871_v14, 1  ;;  %v1290_v35 = vld [vmem:[%s2129_s2 + $0x18] sm:$0xff] }
  0x37   : > { %1462 = vmatpush3.bf16.xpose.msk.msra.mxu1 %vm1822_vm2, %v1460_v16  ;;  %v1508_v6 = vpack.c.bf16 %v856_v62, %v857_v63  ;;  %v850_v8 = vrot.slane %v1892_v25, 1  ;;  %v617_v9 = vsel %vm612_vm7, %v606_v55, %v607_v3  ;;  %v618_v10 = vsel %vm612_vm7, %v605_v50, %v606_v55 }
  0x38   : > { %1463 = vmatprep.subr.bf16.mxu1 %v1686_v1  ;;  %v855_v12 = vsel %vm852_vm6, %v848_v57, %v849_v7  ;;  %v1476_v16 = vpack.c.bf16 %v617_v9, %v618_v10  ;;  %v851_v17 = vrot.slane %v1830_v53, 1  ;;  %v608_v18 = vrot.slane %v1869_v13, 7 }
  0x39   : > { %1498 = vmatpush3.bf16.xpose.msk.msra.mxu0 %vm1822_vm2, %v1496_v19  ;;  %v854_v11 = vsel %vm852_vm6, %v849_v7, %v850_v8  ;;  %v609_v19 = vrot.slane %v1871_v14, 7  ;;  %vm868_vm8 = vcmp.ge.s32.totalorder %v1895_v15, 63  ;;  %v610_v15 = vrot.slane %v1892_v25, 7 }
  0x3a   : > { %1499 = vmatprep.subr.bf16.mxu0 %v1686_v1  ;;  %v1512_v20 = vpack.c.bf16 %v854_v11, %v855_v12  ;;  %v860_v21 = vsel %vm852_vm6, %v851_v17, %v844_v33  ;;  %v616_v53 = vsel %vm612_vm7, %v607_v3, %v608_v18  ;;  %v853_v23 = vsel %vm852_vm6, %v850_v8, %v851_v17 }
  0x3b   : > { %v615_v22 = vsel %vm612_vm7, %v608_v18, %v609_v19  ;;  %v896_v24 = vsel %vm868_vm8, %v1903_v31, %v860_v21  ;;  %v998_v30 = vrot.slane %v1815_v44, 2  ;;  %v613_v33 = vsel %vm612_vm7, %v610_v15, %v611_v45 }
  0x3c   : > { %v1516_v27 = vpack.c.bf16 %v896_v24, %v853_v23  ;;  %v614_v34 = vsel %vm612_vm7, %v609_v19, %v610_v15  ;;  %v1000_v40 = vrot.slane %v1842_v59, 2  ;;  %v1001_v41 = vrot.slane %v1869_v13, 2  ;;  %v1270_v13 = vld [vmem:[%s2129_s2 + $0x8] sm:$0xff] }
  0x3d   : > { %v1484_v31 = vpack.c.bf16 %v613_v33, %v614_v34  ;;  %v1002_v43 = vrot.slane %v1871_v14, 2  ;;  %v1300_v14 = vld [vmem:[%s2129_s2 + $0x20] sm:$0xff] }
  0x3e   : > { %v1009_v37 = vsel %vm1005_vm5, %v1000_v40, %v1001_v41 }
  0x3f   : > { %1466 = vmatpush3.bf16.xpose.msk.msra.mxu1 %vm1822_vm2, %v1464_v26  ;;  %v1480_v26 = vpack.c.bf16 %v615_v22, %v616_v53  ;;  %v1008_v45 = vsel %vm1005_vm5, %v1001_v41, %v1002_v43 }
  0x40   : > { %1467 = vmatprep.subr.bf16.mxu1 %v1686_v1 }
  0x41   : > { %1502 = vmatpush3.bf16.xpose.msk.msra.mxu0 %vm1822_vm2, %v1500_v32  ;;  %v999_v32 = vrot.slane %v1840_v58, 2  ;;  %v1012_v58 = vsel %vm1005_vm5, %v997_v28, %v998_v30 }
  0x42   : > { %1503 = vmatprep.subr.bf16.mxu0 %v1686_v1 }
  0x43   : > { %v1011_v44 = vsel %vm1005_vm5, %v998_v30, %v999_v32  ;;  %v1010_v59 = vsel %vm1005_vm5, %v999_v32, %v1000_v40 }
  0x44   : > { %v1520_v38 = vpack.c.bf16 %v1011_v44, %v1012_v58  ;;  %v1524_v28 = vpack.c.bf16 %v1009_v37, %v1010_v59 }
  0x47   : > { %1470 = vmatpush3.bf16.xpose.msk.msra.mxu1 %vm1822_vm2, %v1468_v48 }
  0x48   : > { %1415 = vmatmul.mubr.msk.f32.vlgmr.msra.gmra.mrb[0].mxu0 %vm505_vm1, %v1280_v51  ;;  %1471 = vmatprep.subr.bf16.mxu1 %v1686_v1 }
  0x49   : > { %1506 = vmatpush3.bf16.xpose.msk.msra.mxu0 %vm1822_vm2, %v1504_v52  ;;  %1433 = vmatprep.mubr.msk.f32.mxu0 %vm1688_vm0, %v1689_v5 }
  0x4a   : > { %1507 = vmatprep.subr.bf16.mxu0 %v1686_v1 }
  0x4e   : > { %1377 = vmatmul.mubr.msk.f32.vlgmr.msra.gmra.mrb[0].mxu1 %vm505_vm1, %v504_v0 }
  0x4f   : > { %1474 = vmatpush3.bf16.xpose.msk.msra.mxu1 %vm1822_vm2, %v1472_v2  ;;  %1395 = vmatprep.mubr.msk.f32.mxu1 %vm1688_vm0, %v1689_v5 }
  0x50   : > { %1475 = vmatprep.subr.bf16.mxu1 %v1686_v1 }
  0x51   : > { %1510 = vmatpush3.bf16.xpose.msk.msra.mxu0 %vm1822_vm2, %v1508_v6 }
  0x52   : > { %1511 = vmatprep.subr.bf16.mxu0 %v1686_v1 }
  0x57   : > { %1478 = vmatpush3.bf16.xpose.msk.msra.mxu1 %vm1822_vm2, %v1476_v16 }
  0x58   : > { %1479 = vmatprep.subr.bf16.mxu1 %v1686_v1 }
  0x59   : > { %1514 = vmatpush3.bf16.xpose.msk.msra.mxu0 %vm1822_vm2, %v1512_v20 }
  0x5a   : > { %1515 = vmatprep.subr.bf16.mxu0 %v1686_v1 }
  0x5f   : > { %1482 = vmatpush3.bf16.xpose.msk.msra.mxu1 %vm1822_vm2, %v1480_v26 }
  0x60   : > { %1483 = vmatprep.subr.bf16.mxu1 %v1686_v1 }
  0x61   : > { %1518 = vmatpush3.bf16.xpose.msk.msra.mxu0 %vm1822_vm2, %v1516_v27 }
  0x62   : > { %1519 = vmatprep.subr.bf16.mxu0 %v1686_v1 }
  0x67   : > { %1486 = vmatpush3.bf16.xpose.msk.msra.mxu1 %vm1822_vm2, %v1484_v31 }
  0x68   : > { %1434 = vmatmul.mubr.msk.f32.vlgmr.msra.gmra.mrb[0].mxu0 %vm505_vm1, %v1290_v35 }
  0x69   : > { %1522 = vmatpush3.bf16.xpose.msk.msra.mxu0 %vm1822_vm2, %v1520_v38  ;;  %1452 = vmatprep.mubr.msk.f32.mxu0 %vm1688_vm0, %v1689_v5  ;;  %v1007_v5 = vsel %vm1005_vm5, %v1002_v43, %v1003_v29 }
  0x6a   : > { %1523 = vmatprep.subr.bf16.mxu0 %v1686_v1  ;;  %v1528_v46 = vpack.c.bf16 %v1007_v5, %v1008_v45 }
  0x6e   : > { %1396 = vmatmul.mubr.msk.f32.vlgmr.msra.gmra.mrb[0].mxu1 %vm505_vm1, %v1270_v13 }
  0x71   : > { %1526 = vmatpush3.bf16.xpose.msk.msra.mxu0 %vm1822_vm2, %v1524_v28 }
  0x72   : > { %1527 = vmatprep.subr.bf16.mxu0 %v1686_v1 }
  0x79   : > { %1530 = vmatpush3.bf16.xpose.msk.msra.mxu0 %vm1822_vm2, %v1528_v46 }
  0x7a   : > { %1531 = vmatprep.subr.bf16.mxu0 %v1686_v1 }
  0x81   : > { %1534 = vmatpush3.bf16.xpose.msk.msra.mxu0 %vm1822_vm2, %v1532_v42 }
  0x88   : > { %1453 = vmatmul.mubr.msk.f32.vlgmr.msra.gmra.mrb[0].mxu0 %vm505_vm1, %v1300_v14 }
  0x91   : > { %v434_v29 = vpop.permute.xlu0 %433 }
 0x141   : > { %v747_v4 = vpop.f32.mrb[0].mxu1 }
 0x142   : > { %v1397_v25 = vpop.f32.mrb[1].mxu1  ;;  %v1535_v1 = vadd.f32 %v747_v4, %v434_v29 }
 0x15b   : > { %v1141_v36 = vpop.f32.mrb[0].mxu0 }
 0x15c   : > { %v1536_v49 = vadd.f32 %v1535_v1, %v1141_v36  ;;  %v1454_v39 = vpop.f32.mrb[1].mxu0 }
 0x15e   : > { %1147 = vst.msk [vmem:[%s236_s11] sm:$0xff] %vm1146_vm9, %v1536_v49 }
 0x15f   : > { %1619 = shalt.err (!%p1616_p5)
}
 0x160   : > { %s1620_s30 = scalar_lea.hbm %s2080_s21, 128  ;;  %s1624_s7 = scalar_lea.hbm %s2131_s4, 256 }
 0x161   : > { %p1621_p6 = scmp.ne.s32.totalorder %s2080_s21, %s1620_s30  ;;  %p1625_p10 = scmp.lt.u32.totalorder %s2080_s21, %s2131_s4 }
 0x162   : > { %p1626_p11 = scmp.lt.u32.totalorder %s1624_s7, %s1620_s30  ;;  %p1628_p13 = scmp.lt.u32.totalorder %s1620_s30, %s2080_s21 }
 0x163   : > { %p1622_p7 = pnand %p1621_p6, %p1757_p4 }
 0x164   : > { %p1627_p12 = por %p1626_p11, %p1625_p10 }
 0x165   : > { %p1623_p9 = pneg %p1622_p7 }
 0x166   : > { %p1629_p0 = por %p1628_p13, %p1627_p12 }
 0x168   : > { %p1630_p1 = pnand %p1629_p0, %p1623_p9 }
 0x16a   : > { %1633 = shalt.err (!%p1630_p1)
}
 0x16b   : > { %1543 = dma.vmem_to_hbm [thread:$0]  (%p1757_p4), %s2082_s12, 128, %s2080_s21, %s1149_s22  }
 0x16c PF: > { %p1549_p2 = scmp.ge.s32.totalorder %s1684_s20, 2  ;;  %s1175_s10 = sand.u32 1, %s1664_s15  }
 0x16d   : > { %s1176_s11 = scalar_lea.sflag [#allocation3], %s1175_s10 }
 0x16e   : > { %p1546_p3 = pnand %p1549_p2, %p1764_p8 }
 0x170   : > { %1659 = dma.done.wait (!%p1546_p3), %s1176_s11, 128  }
 0x171   : > { %1661 = vsyncadd (!%p1546_p3), %s1176_s11, 4294967168  ;;  %s17_s20 = sadd.s32 1, %s1684_s20   ;;  %s2136_s15 = smov %s1668_s16 }
 0x172   : > { %p14_p5 = scmp.ge.s32.totalorder %s17_s20, 4   ;;  %s2137_s16 = smov %s1672_s17 }
 0x173   : > { %s2138_s17 = smov %s1770_s28  ;;  %s2139_s18 = smov %s1680_s19 }
 0x174   : > { %s2140_s19 = smov %s2142_s23  ;;  %16 = sbr.rel (!%p14_p5) target bundleno = 4 (0x4), region = 78 }
 0x17b   :  { %1181 = vsyncpa [#allocation3], 1 }
 0x17c   :  { %1183 = vsyncpa [#allocation3 + $0x1], 1 }

</bundles_post_ra>
